<compile_context>
chip_gen: v7x
topology: tpu7x:2x2x1
jax: 0.10.0
libtpu: 0.0.40
codegen_flags: <defaults>
</compile_context>

<pallas_src>
import jax
import jax.numpy as jnp
from jax.experimental import pallas as pl
from jax.experimental.pallas import tpu as pltpu


# ---------------------------------------------------------------------------
# helpers
# ---------------------------------------------------------------------------

def _round_up(x, m):
    return ((x + m - 1) // m) * m


def _pick_tile(padded_extent, align, cap):
    """Largest multiple of `align` that divides `padded_extent` and is <= cap."""
    cap = min(cap, padded_extent)
    best = align
    c = align
    while c <= cap:
        if padded_extent % c == 0:
            best = c
        c += align
    return best


def _device_caps():
    """(tm_cap, tn_cap, tk_cap, vmem_limit_bytes) derived from VMEM capacity."""
    vmem_bytes = 64 * 1024 * 1024              # conservative default (v7x-sized)
    try:
        info = pltpu.get_tpu_info()
        vmem_bytes = int(getattr(info, "vmem_capacity_bytes", vmem_bytes))
    except Exception:
        pass
    if vmem_bytes >= 100 * 1024 * 1024:        # v5e / v6e: 128 MiB VMEM per core
        return 512, 1024, 512, 64 * 1024 * 1024
    return 512, 512, 512, 44 * 1024 * 1024     # v7x: 64 MiB VMEM per core


def _l2_normalize(x, eps=1e-12):
    # mirrors torch.nn.functional.normalize(x, dim=0, eps=eps)
    n = jnp.sqrt(jnp.sum(x * x))
    return x / jnp.maximum(n, eps)


# ---------------------------------------------------------------------------
# kernels
# ---------------------------------------------------------------------------

def _power_iter_kernel(wt_ref, u_ref, vun_ref, wv_ref):
    """One pass over the weight computes BOTH GEMVs of the power iteration.

    wt_ref : VMEM (tkp, doutp)      row-tile of W^T (padded)
    u_ref  : VMEM (1, doutp) f32    current u (padded with zeros)
    vun_ref: VMEM (tkp, 1)   f32    un-normalized v tile = (W^T u)[rows]
    wv_ref : VMEM (1, doutp) f32    accumulates (W^T u) contracted with W^T = W (W^T u)

    VPU multiply + XLU reduce only, so the GEMVs stay HBM-bandwidth bound while
    reading the weight from HBM exactly once per forward.
    """
    k = pl.program_id(0)
    w = wt_ref[...].astype(jnp.float32)
    t = jnp.sum(w * u_ref[...], axis=1, keepdims=True)       # (tkp, 1)
    vun_ref[...] = t

    @pl.when(k == 0)
    def _():
        wv_ref[...] = jnp.zeros_like(wv_ref)

    wv_ref[...] += jnp.sum(w * t, axis=0, keepdims=True)     # (1, doutp)


def _matmul_kernel_f32(scale_ref, x_ref, wt_ref, kb_ref, o_ref):
    """f32 output: accumulate directly into the VMEM-resident output tile."""
    k = pl.program_id(2)

    @pl.when(k == 0)
    def _():
        o_ref[...] = jnp.zeros_like(o_ref)

    o_ref[...] += jnp.dot(x_ref[...], wt_ref[...],
                          preferred_element_type=jnp.float32)

    @pl.when(k == pl.num_programs(2) - 1)
    def _():
        # scale_ref[0] = k_lipschitz / sigma ; kb_ref already holds k_lipschitz * b
        o_ref[...] = o_ref[...] * scale_ref[0] + kb_ref[...]


def _matmul_kernel_acc(scale_ref, x_ref, wt_ref, kb_ref, o_ref, acc_ref):
    """Narrow output dtype (e.g. bf16): f32 scratch accumulator, downcast at the end."""
    k = pl.program_id(2)

    @pl.when(k == 0)
    def _():
        acc_ref[...] = jnp.zeros_like(acc_ref)

    acc_ref[...] += jnp.dot(x_ref[...], wt_ref[...],
                            preferred_element_type=jnp.float32)

    @pl.when(k == pl.num_programs(2) - 1)
    def _():
        o_ref[...] = (acc_ref[...] * scale_ref[0] + kb_ref[...]).astype(o_ref.dtype)


# ---------------------------------------------------------------------------
# module-level wrappers
# ---------------------------------------------------------------------------

def init_spectral_linear(W, b, u0, k_lipschitz=1.0, param_dtype=None):
    """One-time parameter prep (what nn.Module.__init__ / state-dict load does).

    W : (output_dim, input_dim) PyTorch-layout weight
    b : (output_dim,) bias
    u0: (output_dim,) initial power-iteration vector
    Returns a dict of padded, pre-transposed, pre-scaled device arrays + metadata.
    """
    dout, din = W.shape
    dinp = _round_up(din, 128)
    doutp = _round_up(dout, 128)
    if param_dtype is None:
        param_dtype = W.dtype
    # TODO(synk): set param_dtype=jnp.bfloat16 here for ~2x HBM traffic / 2-4x MXU
    # throughput on v6e/v7x when bf16 weights are numerically acceptable; the f32
    # accumulation path below is unchanged.

    wt = jnp.asarray(W).T                                       # transpose once, at init
    wt_p = jnp.pad(wt, ((0, dinp - din), (0, doutp - dout))).astype(param_dtype)
    kb_p = jnp.pad(jnp.asarray(b, jnp.float32) * k_lipschitz,
                   (0, doutp - dout)).reshape(1, doutp)
    u = jnp.asarray(u0, jnp.float32)

    return dict(wt_p=wt_p, kb_p=kb_p, u=u, din=din, dout=dout,
                dinp=dinp, doutp=doutp, k_lipschitz=float(k_lipschitz))


def spectral_linear_forward(x, params):
    """y = k_lipschitz * (x @ (W / sigma)^T + b), one power iteration on u.

    Returns (y, u_new, v_new); persist u_new/v_new across calls like PyTorch buffers.
    TODO(synk): PyTorch only updates u/v in training mode (under no_grad/detach);
    this implementation always runs one iteration, so eval-mode parity requires the
    caller to keep re-using the stored u.
    """
    din, dout = params["din"], params["dout"]
    dinp, doutp = params["dinp"], params["doutp"]
    wt_p, kb_p = params["wt_p"], params["kb_p"]
    k_lip = params["k_lipschitz"]
    u = params["u"]

    B = x.shape[0]
    assert x.shape[1] == din

    tm_cap, tn_cap, tk_cap, vmem_limit = _device_caps()
    w_itemsize = jnp.dtype(wt_p.dtype).itemsize

    # ---- power iteration: one HBM pass over the weight, glue math in f32 ----------
    tkp_cap = max(8, (2 * 1024 * 1024 // max(1, doutp * w_itemsize)) // 8 * 8)
    tkp = _pick_tile(dinp, 8, tkp_cap)
    u_p = jnp.pad(u, (0, doutp - dout)).reshape(1, doutp).astype(jnp.float32)

    vun_p, wvun_p = pl.pallas_call(
        _power_iter_kernel,
        out_shape=(jax.ShapeDtypeStruct((dinp, 1), jnp.float32),
                   jax.ShapeDtypeStruct((1, doutp), jnp.float32)),
        grid_spec=pltpu.PrefetchScalarGridSpec(
            num_scalar_prefetch=0,
            grid=(dinp // tkp,),
            in_specs=[
                pl.BlockSpec((tkp, doutp), lambda k: (k, 0)),      # W^T row tile
                pl.BlockSpec((1, doutp), lambda k: (0, 0)),        # u (resident)
            ],
            out_specs=[
                pl.BlockSpec((tkp, 1), lambda k: (k, 0)),          # un-normalized v
                pl.BlockSpec((1, doutp), lambda k: (0, 0)),        # accumulated W v_un
            ],
        ),
        compiler_params=pltpu.CompilerParams(
            dimension_semantics=("arbitrary",),
            vmem_limit_bytes=vmem_limit,
        ),
    )(wt_p, u_p)

    vun = vun_p[:, 0]                                      # padded rows are exact zeros
    nv = jnp.maximum(jnp.sqrt(jnp.sum(vun * vun)), 1e-12)
    v_new = vun[:din] / nv                                 # v = normalize(W^T u)
    wv = wvun_p[0, :dout] / nv                             # W v
    nu = jnp.maximum(jnp.sqrt(jnp.sum(wv * wv)), 1e-12)
    u_new = wv / nu                                        # u = normalize(W v)
    sigma = jnp.dot(u_new, wv)                             # u^T W v
    w_scale = (k_lip / sigma).astype(jnp.float32).reshape(1)

    # ---- tile selection: divisors of the (8,128)-aligned padded extents ------------
    Bp = _round_up(B, 8)
    tm = _pick_tile(Bp, 8, tm_cap)
    tn = _pick_tile(doutp, 128, tn_cap)
    tk = _pick_tile(dinp, 128, tk_cap)
    # v7x has 2 TensorCores: make sure a "parallel" axis has >= 2 tiles when possible.
    if Bp // tm == 1 and doutp // tn == 1:
        if doutp >= 256:
            tn = _pick_tile(doutp, 128, doutp // 2)
        elif Bp >= 16:
            tm = _pick_tile(Bp, 8, Bp // 2)

    xp = x if (Bp == B and dinp == din) else jnp.pad(x, ((0, Bp - B), (0, dinp - din)))
    if xp.dtype != wt_p.dtype and jnp.dtype(wt_p.dtype).itemsize < jnp.dtype(xp.dtype).itemsize:
        xp = xp.astype(wt_p.dtype)                         # match bf16 weights if used

    grid = (Bp // tm, doutp // tn, dinp // tk)
    out_is_f32 = (x.dtype == jnp.float32)
    kernel = _matmul_kernel_f32 if out_is_f32 else _matmul_kernel_acc
    scratch = [] if out_is_f32 else [pltpu.VMEM((tm, tn), jnp.float32)]

    out_itemsize = jnp.dtype(x.dtype).itemsize
    x_itemsize = jnp.dtype(xp.dtype).itemsize
    cost = pl.CostEstimate(
        flops=2 * Bp * dinp * doutp,
        transcendentals=0,
        bytes_accessed=int(
            x_itemsize * Bp * dinp * (doutp // tn)         # x re-read per N tile
            + w_itemsize * dinp * doutp * (Bp // tm)       # W^T re-read per M tile
            + out_itemsize * Bp * doutp),                  # output write
    )

    out_padded = pl.pallas_call(
        kernel,
        out_shape=jax.ShapeDtypeStruct((Bp, doutp), x.dtype),
        grid_spec=pltpu.PrefetchScalarGridSpec(
            num_scalar_prefetch=0,
            grid=grid,
            in_specs=[
                pl.BlockSpec(memory_space=pltpu.MemorySpace.SMEM),   # (1,) k_lip/sigma
                pl.BlockSpec((tm, tk), lambda i, j, k: (i, k)),      # x tile
                pl.BlockSpec((tk, tn), lambda i, j, k: (k, j)),      # W^T tile
                pl.BlockSpec((1, tn), lambda i, j, k: (0, j)),       # k_lipschitz * b
            ],
            out_specs=pl.BlockSpec((tm, tn), lambda i, j, k: (i, j)),
            scratch_shapes=scratch,
        ),
        compiler_params=pltpu.CompilerParams(
            dimension_semantics=("parallel", "parallel", "arbitrary"),
            vmem_limit_bytes=vmem_limit,
        ),
        cost_estimate=cost,
    )(w_scale, xp, wt_p, kb_p)

    y = out_padded[:B, :dout]
    return y, u_new, v_new


if __name__ == "__main__":
    key = jax.random.PRNGKey(0)
    k_x, k_w, k_b, k_u = jax.random.split(key, 4)

    batch, input_dim, output_dim = 8, 32, 16
    k_lipschitz = 1.0

    x = jax.random.normal(k_x, (batch, input_dim), dtype=jnp.float32)
    # PyTorch-layout weight (output_dim, input_dim), bias (output_dim,)
    W = jax.random.normal(k_w, (output_dim, input_dim), dtype=jnp.float32) * 0.1
    b = jax.random.normal(k_b, (output_dim,), dtype=jnp.float32) * 0.1
    u0 = _l2_normalize(jax.random.normal(k_u, (output_dim,), dtype=jnp.float32))

    # one-time init: transpose, pad, pre-scale bias
    params = init_spectral_linear(W, b, u0, k_lipschitz=k_lipschitz)

    y, u_new, v_new = spectral_linear_forward(x, params)
    y = jax.block_until_ready(y)

    # reference (pure JAX, PyTorch-layout math, mirrors torch.nn.utils.spectral_norm)
    v_ref = _l2_normalize(W.T @ u0)
    Wv_ref = W @ v_ref
    u_ref = _l2_normalize(Wv_ref)
    sigma_ref = u_ref @ Wv_ref
    y_ref = k_lipschitz * (x @ (W / sigma_ref).T + b)

    assert jnp.allclose(y, y_ref, atol=1e-4, rtol=1e-4), \
        float(jnp.max(jnp.abs(y - y_ref)))
    assert jnp.allclose(u_new, u_ref, atol=1e-5, rtol=1e-5)
    assert jnp.allclose(v_new, v_ref, atol=1e-5, rtol=1e-5)

    print("KERNEL_OK")
</pallas_src>

<mosaic_0001>
module attributes {stable_mosaic.version = 11 : i64} {
  func.func @_power_iter_kernel(%arg0: i32, %arg1: memref<128x128xf32, #tpu.memory_space<vmem>>, %arg2: memref<1x128xf32, #tpu.memory_space<vmem>>, %arg3: memref<128x1xf32, #tpu.memory_space<vmem>>, %arg4: memref<1x128xf32, #tpu.memory_space<vmem>>) attributes {dimension_semantics = [#tpu.dimension_semantics<arbitrary>], iteration_bounds = array<i64: 1>, scalar_prefetch = 0 : i64, scratch_operands = 0 : i64, tpu.core_type = #tpu.core_type<tc>, window_params = [{transform_indices = @transform_0, window_bounds = array<i64: 128, 128>}, {pipeline_mode = #tpu.pipeline_mode<synchronous>, transform_indices = @transform_1, window_bounds = array<i64: 1, 128>}, {transform_indices = @transform_2, window_bounds = array<i64: 128, 1>}, {pipeline_mode = #tpu.pipeline_mode<synchronous>, transform_indices = @transform_3, window_bounds = array<i64: 1, 128>}]} {
    %c0 = arith.constant 0 : index
    %c0_0 = arith.constant 0 : index
    %0 = vector.load %arg1[%c0, %c0_0] : memref<128x128xf32, #tpu.memory_space<vmem>>, vector<128x128xf32>
    %c0_1 = arith.constant 0 : index
    %c0_2 = arith.constant 0 : index
    %1 = vector.load %arg2[%c0_1, %c0_2] : memref<1x128xf32, #tpu.memory_space<vmem>>, vector<1x128xf32>
    %2 = vector.broadcast %1 : vector<1x128xf32> to vector<128x128xf32>
    %3 = arith.mulf %0, %2 : vector<128x128xf32>
    %cst = arith.constant dense<0.000000e+00> : vector<128xf32>
    %4 = vector.multi_reduction <add>, %3, %cst [1] : vector<128x128xf32> to vector<128xf32>
    %5 = vector.shape_cast %4 : vector<128xf32> to vector<128x1xf32>
    %c0_3 = arith.constant 0 : index
    %c0_4 = arith.constant 0 : index
    %6 = vector.load %arg3[%c0_3, %c0_4] : memref<128x1xf32, #tpu.memory_space<vmem>>, vector<128x1xf32>
    tpu.vector_store %arg3[%c0_3, %c0_4], %5 {strides = array<i32>} : memref<128x1xf32, #tpu.memory_space<vmem>>, vector<128x1xf32>,
    %c0_i32 = arith.constant 0 : i32
    %7 = arith.cmpi eq, %arg0, %c0_i32 : i32
    %8 = arith.extui %7 : i1 to i32
    %c0_i32_5 = arith.constant 0 : i32
    %9 = arith.cmpi ne, %8, %c0_i32_5 : i32
    scf.if %9 {
      %cst_11 = arith.constant 0.000000e+00 : f32
      %17 = vector.broadcast %cst_11 : f32 to vector<1x128xf32>
      %c0_12 = arith.constant 0 : index
      %c0_13 = arith.constant 0 : index
      %18 = vector.load %arg4[%c0_12, %c0_13] : memref<1x128xf32, #tpu.memory_space<vmem>>, vector<1x128xf32>
      tpu.vector_store %arg4[%c0_12, %c0_13], %17 {strides = array<i32>} : memref<1x128xf32, #tpu.memory_space<vmem>>, vector<1x128xf32>,
    } else {
    }
    %c0_6 = arith.constant 0 : index
    %c0_7 = arith.constant 0 : index
    %10 = vector.load %arg4[%c0_6, %c0_7] : memref<1x128xf32, #tpu.memory_space<vmem>>, vector<1x128xf32>
    %11 = vector.broadcast %5 : vector<128x1xf32> to vector<128x128xf32>
    %12 = arith.mulf %0, %11 : vector<128x128xf32>
    %cst_8 = arith.constant dense<0.000000e+00> : vector<128xf32>
    %13 = vector.multi_reduction <add>, %12, %cst_8 [0] : vector<128x128xf32> to vector<128xf32>
    %14 = vector.shape_cast %13 : vector<128xf32> to vector<1x128xf32>
    %15 = arith.addf %10, %14 : vector<1x128xf32>
    %c0_9 = arith.constant 0 : index
    %c0_10 = arith.constant 0 : index
    %16 = vector.load %arg4[%c0_9, %c0_10] : memref<1x128xf32, #tpu.memory_space<vmem>>, vector<1x128xf32>
    tpu.vector_store %arg4[%c0_9, %c0_10], %15 {strides = array<i32>} : memref<1x128xf32, #tpu.memory_space<vmem>>, vector<1x128xf32>,
    return
  }
  func.func @transform_0(%arg0: i32) -> (i32, i32) {
    %c0_i32 = arith.constant 0 : i32
    %c0_i32_0 = arith.constant 0 : i32
    return %arg0, %c0_i32 : i32, i32
  }
  func.func @transform_1(%arg0: i32) -> (i32, i32) {
    %c0_i32 = arith.constant 0 : i32
    %c0_i32_0 = arith.constant 0 : i32
    %c0_i32_1 = arith.constant 0 : i32
    return %c0_i32, %c0_i32_0 : i32, i32
  }
  func.func @transform_2(%arg0: i32) -> (i32, i32) {
    %c0_i32 = arith.constant 0 : i32
    %c0_i32_0 = arith.constant 0 : i32
    return %arg0, %c0_i32 : i32, i32
  }
  func.func @transform_3(%arg0: i32) -> (i32, i32) {
    %c0_i32 = arith.constant 0 : i32
    %c0_i32_0 = arith.constant 0 : i32
    %c0_i32_1 = arith.constant 0 : i32
    return %c0_i32, %c0_i32_0 : i32, i32
  }
}

</mosaic_0001>

<bundles_post_ra>
// kernel: tpu_custom_call.1
= control target key start
LH: loop header
LB: loop body
LE: loop exit
PB: predicated region body
PF: predicated region fallthrough
CT: control target
= control target key end

     0   :  { %9 = vsyncpa [#allocation3], 0  ;;  %s378_s0 = inlined_call_operand.hbm [shape: f32[128,128], index: 0, kind: input, shape index: {}]   ;;  %s379_s1 = inlined_call_operand.vmem [shape: f32[1,128], index: 1, kind: input, shape index: {}]   ;;  %s380_s2 = inlined_call_operand.vmem [shape: f32[128,1], index: 2, kind: output, shape index: {0}]   ;;  %s381_s3 = inlined_call_operand.hbm [shape: f32[1,128], index: 3, kind: output, shape index: {1}]  }
   0x1   :  { %10 = vsyncpa [#allocation4], 0  ;;  %s234_s12 = smov [#allocation2]   ;;  %s186_s16 = scalar_lea.hbm %s378_s0, 2048 }
   0x2   :  { %s16_s13 = sshll.u32 %s234_s12, 4  ;;  %p187_p0 = scmp.ne.s32.totalorder %s378_s0, %s186_s16  ;;  %s17_s13 = int_to_ptr.vmem [resolvable:$true] %s16_s13 }
   0x3   :  { %p190_p1 = scmp.lt.u32.totalorder %s186_s16, %s378_s0 }
   0x5   :  { %p192_p2 = pnand %p190_p1, %p187_p0 }
   0x7   :  { %195 = shalt.err (!%p192_p2)
}
   0x8   :  { %s196_s21 = scalar_lea.vmem %s17_s13, 2048  ;;  %p201_p4 = scmp.lt.s32.totalorder %s17_s13, %s17_s13 }
   0x9   :  { %p197_p3 = scmp.ne.s32.totalorder %s17_s13, %s196_s21  ;;  %p202_p5 = scmp.lt.s32.totalorder %s196_s21, %s196_s21 }
   0xb   :  { %p203_p6 = por %p202_p5, %p201_p4 }
   0xd   :  { %p204_p7 = pnand %p203_p6, %p197_p3 }
   0xf   :  { %207 = shalt.err (!%p204_p7)
}
  0x10   :  { %s235_s22 = smov 128   ;;  %s236_s23 = smov 8  }
  0x11   :  { %22 = dma.hbm_to_vmem [thread:$0]  %s378_s0, 2048, %s17_s13, [#allocation3], %s235_s22, %s235_s22, %s236_s23  }
  0x12   :  { %230 = dma.done.wait [#allocation3], 2048  }
  0x13   :  { %231 = vsyncadd [#allocation3], 4294965248  ;;  %v28_v0 = vld [vmem:[#allocation2] sm:$0xff]  ;;  %v30_v2 = vld [vmem:[#allocation2 + $0x10] sm:$0xff]  ;;  %v237_v33 = vmov 0.0   ;;  %vm99_vm0 = vcmask 7168  }
  0x14   :  { %v180_v1 = vld [vmem:[%s379_s1] ss:$0 sm:$0xff]  ;;  %v29_v5 = vld [vmem:[#allocation2 + $0x8] sm:$0xff]  ;;  %v31_v6 = vld [vmem:[#allocation2 + $0x18] sm:$0xff]  ;;  %120 = vst [vmem:[#allocation5] sm:$0x1] %v237_v33 }
  0x15   :  { %v51_v3 = vmul.f32 %v180_v1, %v28_v0  ;;  %v53_v4 = vmul.f32 %v180_v1, %v30_v2  ;;  %v52_v7 = vmul.f32 %v180_v1, %v29_v5  ;;  %v54_v8 = vmul.f32 %v180_v1, %v31_v6  ;;  %v32_v9 = vld [vmem:[#allocation2 + $0x20] sm:$0xff]  ;;  %v33_v10 = vld [vmem:[#allocation2 + $0x28] sm:$0xff]  ;;  %v34_v13 = vld [vmem:[#allocation2 + $0x30] sm:$0xff]  ;;  %s238_s29 = smov [#allocation5]  }
  0x16   :  { %v55_v11 = vmul.f32 %v180_v1, %v32_v9  ;;  %v56_v12 = vmul.f32 %v180_v1, %v33_v10  ;;  %v35_v14 = vld [vmem:[#allocation2 + $0x38] sm:$0xff]  ;;  %v57_v15 = vmul.f32 %v180_v1, %v34_v13  ;;  %v36_v17 = vld [vmem:[#allocation2 + $0x40] sm:$0xff]  ;;  %v274_v18 = vld [vmem:[#allocation2 + $0x48] sm:$0xff]  ;;  %s169_s30 = sshll.u32 %s238_s29, 4  ;;  %s170_s30 = int_to_ptr.vmem [resolvable:$true] %s169_s30 }
  0x17   :  { %67 = vadd.xlane.f32.xlu0 %v51_v3  ;;  %71 = vadd.xlane.f32.xlu1 %v53_v4  ;;  %v58_v16 = vmul.f32 %v180_v1, %v35_v14  ;;  %v59_v19 = vmul.f32 %v180_v1, %v36_v17  ;;  %v60_v20 = vmul.f32 %v180_v1, %v274_v18  ;;  %v277_v21 = vld [vmem:[#allocation2 + $0x50] sm:$0xff]  ;;  %v279_v22 = vld [vmem:[#allocation2 + $0x58] sm:$0xff]  ;;  %v283_v25 = vld [vmem:[#allocation2 + $0x60] sm:$0xff]  ;;  %s208_s4 = scalar_lea.vmem %s170_s30, 16  ;;  %p213_p9 = scmp.lt.s32.totalorder %s170_s30, %s170_s30 }
  0x18   :  { %v61_v23 = vmul.f32 %v180_v1, %v277_v21  ;;  %v62_v24 = vmul.f32 %v180_v1, %v279_v22  ;;  %v285_v26 = vld [vmem:[#allocation2 + $0x68] sm:$0xff]  ;;  %v63_v27 = vmul.f32 %v180_v1, %v283_v25  ;;  %v289_v29 = vld [vmem:[#allocation2 + $0x70] sm:$0xff]  ;;  %v291_v30 = vld [vmem:[#allocation2 + $0x78] sm:$0xff]  ;;  %p209_p8 = scmp.ne.s32.totalorder %s170_s30, %s208_s4 }
  0x19   :  { %v64_v28 = vmul.f32 %v180_v1, %v285_v26  ;;  %v65_v31 = vmul.f32 %v180_v1, %v289_v29  ;;  %v66_v32 = vmul.f32 %v180_v1, %v291_v30 }
  0x1b   :  { %69 = vadd.xlane.f32.xlu0 %v52_v7  ;;  %73 = vadd.xlane.f32.xlu1 %v54_v8 }
  0x1f   :  { %75 = vadd.xlane.f32.xlu0 %v55_v11  ;;  %77 = vadd.xlane.f32.xlu1 %v56_v12 }
  0x23   :  { %79 = vadd.xlane.f32.xlu0 %v57_v15  ;;  %81 = vadd.xlane.f32.xlu1 %v58_v16 }
  0x27   :  { %83 = vadd.xlane.f32.xlu0 %v59_v19  ;;  %85 = vadd.xlane.f32.xlu1 %v60_v20 }
  0x2b   :  { %87 = vadd.xlane.f32.xlu0 %v61_v23  ;;  %89 = vadd.xlane.f32.xlu1 %v62_v24 }
  0x2f   :  { %91 = vadd.xlane.f32.xlu0 %v63_v27  ;;  %93 = vadd.xlane.f32.xlu1 %v64_v28 }
  0x33   :  { %95 = vadd.xlane.f32.xlu0 %v65_v31  ;;  %97 = vadd.xlane.f32.xlu1 %v66_v32 }
  0xa4   :  { %v68_v34 = vpop.xlane.xlu0 %67  ;;  %v72_v35 = vpop.xlane.xlu1 %71 }
  0xa5   :  { %100 = vst.msk [vmem:[%s380_s2] sm:$0xff] %vm99_vm0, %v68_v34  ;;  %102 = vst.msk [vmem:[%s380_s2 + $0x10] sm:$0xff] %vm99_vm0, %v72_v35  ;;  %v122_v38 = vmul.f32 %v68_v34, %v28_v0  ;;  %v124_v40 = vmul.f32 %v72_v35, %v30_v2 }
  0xa8   :  { %v70_v36 = vpop.xlane.xlu0 %69  ;;  %v74_v37 = vpop.xlane.xlu1 %73 }
  0xa9   :  { %101 = vst.msk [vmem:[%s380_s2 + $0x8] sm:$0xff] %vm99_vm0, %v70_v36  ;;  %v123_v39 = vmul.f32 %v70_v36, %v29_v5  ;;  %103 = vst.msk [vmem:[%s380_s2 + $0x18] sm:$0xff] %vm99_vm0, %v74_v37  ;;  %v125_v42 = vmul.f32 %v74_v37, %v31_v6 }
  0xab   :  { %v138_v41 = vadd.f32 %v123_v39, %v122_v38 }
  0xac   :  { %v76_v43 = vpop.xlane.xlu0 %75  ;;  %v78_v44 = vpop.xlane.xlu1 %77 }
  0xad   :  { %v139_v45 = vadd.f32 %v138_v41, %v124_v40  ;;  %104 = vst.msk [vmem:[%s380_s2 + $0x20] sm:$0xff] %vm99_vm0, %v76_v43  ;;  %v126_v46 = vmul.f32 %v76_v43, %v32_v9  ;;  %105 = vst.msk [vmem:[%s380_s2 + $0x28] sm:$0xff] %vm99_vm0, %v78_v44  ;;  %v127_v48 = vmul.f32 %v78_v44, %v33_v10 }
  0xaf   :  { %v140_v47 = vadd.f32 %v139_v45, %v125_v42 }
  0xb0   :  { %v80_v49 = vpop.xlane.xlu0 %79  ;;  %v82_v50 = vpop.xlane.xlu1 %81 }
  0xb1   :  { %v141_v51 = vadd.f32 %v140_v47, %v126_v46  ;;  %106 = vst.msk [vmem:[%s380_s2 + $0x30] sm:$0xff] %vm99_vm0, %v80_v49  ;;  %v128_v52 = vmul.f32 %v80_v49, %v34_v13  ;;  %107 = vst.msk [vmem:[%s380_s2 + $0x38] sm:$0xff] %vm99_vm0, %v82_v50  ;;  %v129_v54 = vmul.f32 %v82_v50, %v35_v14 }
  0xb3   :  { %v142_v53 = vadd.f32 %v141_v51, %v127_v48 }
  0xb4   :  { %v84_v55 = vpop.xlane.xlu0 %83  ;;  %v86_v56 = vpop.xlane.xlu1 %85 }
  0xb5   :  { %v143_v57 = vadd.f32 %v142_v53, %v128_v52  ;;  %108 = vst.msk [vmem:[%s380_s2 + $0x40] sm:$0xff] %vm99_vm0, %v84_v55  ;;  %v130_v58 = vmul.f32 %v84_v55, %v36_v17  ;;  %109 = vst.msk [vmem:[%s380_s2 + $0x48] sm:$0xff] %vm99_vm0, %v86_v56  ;;  %v131_v60 = vmul.f32 %v86_v56, %v274_v18 }
  0xb7   :  { %v144_v59 = vadd.f32 %v143_v57, %v129_v54 }
  0xb8   :  { %v88_v61 = vpop.xlane.xlu0 %87  ;;  %v90_v62 = vpop.xlane.xlu1 %89 }
  0xb9   :  { %v145_v63 = vadd.f32 %v144_v59, %v130_v58  ;;  %110 = vst.msk [vmem:[%s380_s2 + $0x50] sm:$0xff] %vm99_vm0, %v88_v61  ;;  %v132_v0 = vmul.f32 %v88_v61, %v277_v21  ;;  %111 = vst.msk [vmem:[%s380_s2 + $0x58] sm:$0xff] %vm99_vm0, %v90_v62  ;;  %v133_v2 = vmul.f32 %v90_v62, %v279_v22  ;;  %v121_v22 = vld [vmem:[#allocation5] sm:$0x1] }
  0xbb   :  { %v146_v1 = vadd.f32 %v145_v63, %v131_v60 }
  0xbc   :  { %v92_v3 = vpop.xlane.xlu0 %91  ;;  %v94_v4 = vpop.xlane.xlu1 %93 }
  0xbd   :  { %v147_v5 = vadd.f32 %v146_v1, %v132_v0  ;;  %112 = vst.msk [vmem:[%s380_s2 + $0x60] sm:$0xff] %vm99_vm0, %v92_v3  ;;  %v134_v6 = vmul.f32 %v92_v3, %v283_v25  ;;  %113 = vst.msk [vmem:[%s380_s2 + $0x68] sm:$0xff] %vm99_vm0, %v94_v4  ;;  %v135_v8 = vmul.f32 %v94_v4, %v285_v26 }
  0xbf   :  { %v148_v7 = vadd.f32 %v147_v5, %v133_v2 }
  0xc0   :  { %v96_v9 = vpop.xlane.xlu0 %95  ;;  %v98_v10 = vpop.xlane.xlu1 %97 }
  0xc1   :  { %v149_v11 = vadd.f32 %v148_v7, %v134_v6  ;;  %114 = vst.msk [vmem:[%s380_s2 + $0x70] sm:$0xff] %vm99_vm0, %v96_v9  ;;  %v136_v12 = vmul.f32 %v96_v9, %v289_v29  ;;  %115 = vst.msk [vmem:[%s380_s2 + $0x78] sm:$0xff] %vm99_vm0, %v98_v10  ;;  %v137_v14 = vmul.f32 %v98_v10, %v291_v30  ;;  %s212_s2 = scalar_lea.vmem %s170_s30, 32 }
  0xc2   :  { %p214_p10 = scmp.lt.s32.totalorder %s212_s2, %s208_s4 }
  0xc3   :  { %v150_v13 = vadd.f32 %v149_v11, %v135_v8 }
  0xc4   :  { %p215_p11 = por %p214_p10, %p213_p9 }
  0xc5   :  { %v151_v15 = vadd.f32 %v150_v13, %v136_v12 }
  0xc6   :  { %p216_p12 = pnand %p215_p11, %p209_p8 }
  0xc7   :  { %v152_v16 = vadd.f32 %v151_v15, %v137_v14 }
  0xc9   :  { %v153_v17 = vrot.slane %v152_v16, 4 }
  0xcb   :  { %v154_v18 = vadd.f32 %v153_v17, %v152_v16 }
  0xcd   :  { %v155_v19 = vrot.slane %v154_v18, 2 }
  0xcf   :  { %v156_v20 = vadd.f32 %v155_v19, %v154_v18 }
  0xd1   :  { %v157_v21 = vrot.slane %v156_v20, 1 }
  0xd3   :  { %v158_v23 = vadd.f32 %v157_v21, %v156_v20 }
  0xd5   :  { %v159_v24 = vadd.f32 %v158_v23, %v121_v22 }
  0xd7   :  { %160 = vst [vmem:[#allocation5] sm:$0x1] %v159_v24 }
  0xd8   :  { %219 = shalt.err (!%p216_p12)
}
  0xd9   :  { %s220_s7 = scalar_lea.hbm %s381_s3, 16 }
  0xda   :  { %p221_p13 = scmp.ne.s32.totalorder %s381_s3, %s220_s7  ;;  %p224_p0 = scmp.lt.u32.totalorder %s220_s7, %s381_s3 }
  0xdc   :  { %p226_p1 = pnand %p224_p0, %p221_p13 }
  0xde   :  { %229 = shalt.err (!%p226_p1)
}
  0xdf   :  { %172 = dma.vmem_to_hbm [thread:$0]  %s170_s30, 16, %s381_s3, [#allocation4]  }
  0xe0   :  { %232 = dma.done.wait [#allocation4], 16  }
  0xe1   :  { %233 = vsyncadd [#allocation4], 4294967280 }
  0xe2   :  { %178 = vsyncpa [#allocation3], 1 }
  0xe3   :  { %179 = vsyncpa [#allocation4], 1 }

</bundles_post_ra>
